<compile_context>
chip_gen: v6e
topology: v6e:2x2x1
jax: 0.10.0
libtpu: 0.0.40
codegen_flags: <defaults>
</compile_context>

<pallas_src>
import functools

import jax
import jax.numpy as jnp
from jax import lax
from jax.experimental import pallas as pl
from jax.experimental.pallas import tpu as pltpu


def _round_up(x, m):
    return ((x + m - 1) // m) * m


def _cdiv(a, b):
    return -(-a // b)


def _image_loss_kernel(pred_ref, tgt_ref, pn_ref, tn_ref, out_ref, acc_ref, *,
                       P, R, p_tile, r_tile, target_transposed,
                       mask_rows, mask_cols):
    # pred_ref: (1, p_tile, M) input dtype       pn_ref: (1, p_tile, 1) f32
    # tgt_ref:  (1, M, r_tile) or (1, r_tile, M) tn_ref: (1, 1, r_tile) f32
    # out_ref:  (1, 1, 1) f32 partial per (b, i) block
    # acc_ref:  (1, r_tile) f32 vector accumulator (resident across j)
    i = pl.program_id(1)
    j = pl.program_id(2)
    nj = pl.num_programs(2)

    @pl.when(j == 0)
    def _():
        acc_ref[...] = jnp.zeros_like(acc_ref)

    p = pred_ref[0]                                   # (p_tile, M)
    t = tgt_ref[0]
    if target_transposed:
        # (p_tile, M) x (M, r_tile) — MXU-native, target pre-relaid in HBM.
        cross = lax.dot_general(p, t, (((1,), (0,)), ((), ())),
                                preferred_element_type=jnp.float32)
    else:
        # (p_tile, M) x (r_tile, M)^T — q.k^T style contraction, no relayout.
        cross = lax.dot_general(p, t, (((1,), (1,)), ((), ())),
                                preferred_element_type=jnp.float32)

    pn = pn_ref[0]                                    # (p_tile, 1) f32
    tn = tn_ref[0]                                    # (1, r_tile) f32, lane-dense

    # ||p_i - t_j||^2 = ||p_i||^2 + ||t_j||^2 - 2 p_i.t_j  (norms precomputed)
    d2 = pn + tn - 2.0 * cross
    d = jnp.sqrt(jnp.maximum(d2, 0.0))                # (p_tile, r_tile)

    # Tail masking (only emitted when P/R are not tile multiples).
    if mask_rows or mask_cols:
        valid = None
        if mask_rows:
            rows_left = P - i * p_tile
            valid = lax.broadcasted_iota(jnp.int32, (p_tile, r_tile), 0) < rows_left
        if mask_cols:
            cols_left = R - j * r_tile
            cv = lax.broadcasted_iota(jnp.int32, (p_tile, r_tile), 1) < cols_left
            valid = cv if valid is None else jnp.logical_and(valid, cv)
        d = jnp.where(valid, d, 0.0)

    # Vector accumulate: fold sublanes, keep the lane-dense (1, r_tile) vector.
    acc_ref[...] += jnp.sum(d, axis=0, keepdims=True)

    @pl.when(j == nj - 1)
    def _():
        s = jnp.sum(acc_ref[...], axis=1, keepdims=True)   # (1, 1)
        out_ref[...] = s.reshape(1, 1, 1)


def _vmem_bytes(pt, rt, M, itemsize):
    dbuf_inputs = 2 * (pt * M + rt * M) * itemsize     # pred + target tiles (double-buffered)
    dbuf_norms = 2 * (pt * 128 + 8 * rt) * 4           # pn / tn tiles incl. padding
    intermediates = 4 * pt * rt * 4                    # cross / d2 / d / mask temps
    return dbuf_inputs + dbuf_norms + intermediates + 8 * rt * 4


def image_loss(pred, target, weight=1.0):
    """Pallas equivalent of ImageLoss(weight)(pred, target) -> (B,) float32."""
    B, P, M = pred.shape
    B2, R, M2 = target.shape
    assert B == B2 and M == M2, "pred/target must share batch and feature dims"

    # --- role choice (HBM re-stream minimization): the row-tiled operand is
    # read once, the lane-tiled operand is re-streamed n_i times; cdist's
    # pairwise mean is symmetric, so swap if that lowers total traffic.
    def _traffic(rows, cols):
        pt = min(512, _round_up(rows, 8))
        return rows * M + _cdiv(rows, pt) * cols * M

    if _traffic(R, P) < _traffic(P, R):
        pred, target = target, pred
        P, R = R, P

    # --- hoisted row norms (computed once by XLA, streamed as tiny inputs).
    pf = pred.astype(jnp.float32)
    tf = target.astype(jnp.float32)
    pn = jnp.sum(pf * pf, axis=2, keepdims=True)       # (B, P, 1)
    tn = jnp.sum(tf * tf, axis=2)[:, None, :]          # (B, 1, R)

    # --- VMEM budget / tile selection.
    try:
        vmem_cap = int(pltpu.get_tpu_info().vmem_capacity_bytes)
    except Exception:
        vmem_cap = 64 << 20
    vmem_limit = max(32 << 20, min((vmem_cap * 3) // 4, 112 << 20))

    itemsize = jnp.dtype(pred.dtype).itemsize
    p_tile = min(512, _round_up(P, 8))
    r_tile = min(512, _round_up(R, 128))
    budget = vmem_limit // 2
    while _vmem_bytes(p_tile, r_tile, M, itemsize) > budget:
        if p_tile >= 2 * r_tile and p_tile > 8:
            p_tile = _round_up(max(8, p_tile // 2), 8)
        elif r_tile > 128:
            r_tile = _round_up(max(128, r_tile // 2), 128)
        elif p_tile > 8:
            p_tile = _round_up(max(8, p_tile // 2), 8)
        else:
            break

    n_i = _cdiv(P, p_tile)
    n_j = _cdiv(R, r_tile)

    # --- conditional HBM relayout: only pay 2x target traffic up front when
    # the kernel re-reads the target more than twice.
    transpose_target = n_i > 2
    if transpose_target:
        tgt_in = jnp.transpose(target, (0, 2, 1))      # (B, M, R)
        tgt_spec = pl.BlockSpec((1, M, r_tile), lambda b, i, j: (b, 0, j))
    else:
        tgt_in = target                                # (B, R, M)
        tgt_spec = pl.BlockSpec((1, r_tile, M), lambda b, i, j: (b, j, 0))

    kernel = functools.partial(
        _image_loss_kernel,
        P=P, R=R, p_tile=p_tile, r_tile=r_tile,
        target_transposed=transpose_target,
        mask_rows=(P % p_tile != 0), mask_cols=(R % r_tile != 0),
    )

    partials = pl.pallas_call(
        kernel,
        out_shape=jax.ShapeDtypeStruct((B * n_i, 1, 1), jnp.float32),
        grid=(B, n_i, n_j),
        in_specs=[
            pl.BlockSpec((1, p_tile, M), lambda b, i, j: (b, i, 0)),
            tgt_spec,
            pl.BlockSpec((1, p_tile, 1), lambda b, i, j: (b, i, 0)),
            pl.BlockSpec((1, 1, r_tile), lambda b, i, j: (b, 0, j)),
        ],
        out_specs=pl.BlockSpec((1, 1, 1), lambda b, i, j: (b * n_i + i, 0, 0)),
        scratch_shapes=[pltpu.VMEM((1, r_tile), jnp.float32)],
        compiler_params=pltpu.CompilerParams(
            dimension_semantics=("parallel", "parallel", "arbitrary"),
            vmem_limit_bytes=vmem_limit,
        ),
    )(pred, tgt_in, pn, tn)

    per_batch = jnp.sum(partials.reshape(B, n_i), axis=1)
    return per_batch * (float(weight) / float(P * R))


def _reference(pred, target, weight):
    # Exact pairwise-difference formulation, as torch.cdist.
    diff = pred[:, :, None, :] - target[:, None, :, :]
    return jnp.sqrt(jnp.sum(diff * diff, axis=-1)).mean(axis=(1, 2)) * weight


if __name__ == "__main__":
    key = jax.random.PRNGKey(0)
    k1, k2, k3, k4, k5, k6 = jax.random.split(key, 6)
    weight = 1.0  # ImageLoss(weight=1.0)

    # Case 1: small shapes (single tile, masked lane tail since R < 128).
    B, P, R, M = 2, 16, 16, 8
    pred = jax.random.normal(k1, (B, P, M), dtype=jnp.float32)
    target = jax.random.normal(k2, (B, R, M), dtype=jnp.float32)
    out = jax.block_until_ready(image_loss(pred, target, weight))
    ref = _reference(pred, target, weight)
    assert out.shape == (B,)
    assert jnp.allclose(out, ref, atol=1e-4, rtol=1e-4), (out, ref)

    # Case 2: multi-tile reduction with tail masking on both axes
    # (n_i > 2 -> exercises the pre-transposed target path).
    P2, R2 = 1280, 1280
    pred2 = jax.random.normal(k3, (B, P2, M), dtype=jnp.float32)
    target2 = jax.random.normal(k4, (B, R2, M), dtype=jnp.float32)
    out2 = jax.block_until_ready(image_loss(pred2, target2, weight))
    ref2 = _reference(pred2, target2, weight)
    assert out2.shape == (B,)
    assert jnp.allclose(out2, ref2, atol=1e-3, rtol=1e-3), (out2, ref2)

    # Case 3: awkward (non multiple-of-8/128) sizes -> masked tail blocks,
    # raw-layout (q.k^T) contraction path.
    P3, R3, M3 = 50, 130, 7
    pred3 = jax.random.normal(k5, (B, P3, M3), dtype=jnp.float32)
    target3 = jax.random.normal(k6, (B, R3, M3), dtype=jnp.float32)
    out3 = jax.block_until_ready(image_loss(pred3, target3, weight))
    ref3 = _reference(pred3, target3, weight)
    assert out3.shape == (B,)
    assert jnp.allclose(out3, ref3, atol=1e-4, rtol=1e-4), (out3, ref3)

    print("KERNEL_OK")
</pallas_src>

<mosaic_0001>
module attributes {stable_mosaic.version = 11 : i64} {
  func.func @_image_loss_kernel(%arg0: i32, %arg1: i32, %arg2: i32, %arg3: memref<1x16x8xf32, #tpu.memory_space<vmem>>, %arg4: memref<1x128x8xf32, #tpu.memory_space<vmem>>, %arg5: memref<1x16x1xf32, #tpu.memory_space<vmem>>, %arg6: memref<1x1x128xf32, #tpu.memory_space<vmem>>, %arg7: memref<1x1x1xf32, #tpu.memory_space<vmem>>, %arg8: memref<1x128xf32, #tpu.memory_space<vmem>>) attributes {dimension_semantics = [#tpu.dimension_semantics<parallel>, #tpu.dimension_semantics<parallel>, #tpu.dimension_semantics<arbitrary>], iteration_bounds = array<i64: 2, 1, 1>, scalar_prefetch = 0 : i64, scratch_operands = 1 : i64, tpu.core_type = #tpu.core_type<tc>, window_params = [{transform_indices = @transform_0, window_bounds = array<i64: 1, 16, 8>}, {transform_indices = @transform_1, window_bounds = array<i64: 1, 128, 8>}, {transform_indices = @transform_2, window_bounds = array<i64: 1, 16, 1>}, {transform_indices = @transform_3, window_bounds = array<i64: 1, 1, 128>}, {transform_indices = @transform_4, window_bounds = array<i64: 1, 1, 1>}]} {
    %c0_i32 = arith.constant 0 : i32
    %0 = arith.cmpi eq, %arg2, %c0_i32 : i32
    %1 = arith.extui %0 : i1 to i32
    %c0_i32_0 = arith.constant 0 : i32
    %2 = arith.cmpi ne, %1, %c0_i32_0 : i32
    scf.if %2 {
      %cst_22 = arith.constant 0.000000e+00 : f32
      %36 = vector.broadcast %cst_22 : f32 to vector<1x128xf32>
      %c0_23 = arith.constant 0 : index
      %c0_24 = arith.constant 0 : index
      %37 = vector.load %arg8[%c0_23, %c0_24] : memref<1x128xf32, #tpu.memory_space<vmem>>, vector<1x128xf32>
      tpu.vector_store %arg8[%c0_23, %c0_24], %36 {strides = array<i32>} : memref<1x128xf32, #tpu.memory_space<vmem>>, vector<1x128xf32>,
    } else {
    }
    %c0 = arith.constant 0 : index
    %c0_1 = arith.constant 0 : index
    %c0_2 = arith.constant 0 : index
    %3 = vector.load %arg3[%c0, %c0_1, %c0_2] : memref<1x16x8xf32, #tpu.memory_space<vmem>>, vector<1x16x8xf32>
    %4 = vector.shape_cast %3 : vector<1x16x8xf32> to vector<16x8xf32>
    %c0_3 = arith.constant 0 : index
    %c0_4 = arith.constant 0 : index
    %c0_5 = arith.constant 0 : index
    %5 = vector.load %arg4[%c0_3, %c0_4, %c0_5] : memref<1x128x8xf32, #tpu.memory_space<vmem>>, vector<1x128x8xf32>
    %6 = vector.shape_cast %5 : vector<1x128x8xf32> to vector<128x8xf32>
    %cst = arith.constant dense<0.000000e+00> : vector<16x128xf32>
    %7 = tpu.matmul %4, %6, %cst {dimension_numbers = #tpu.dot_dimension_numbers<[1], [1], [0], [0], [0, 0, 1, 0], [], []>} : vector<16x8xf32>, vector<128x8xf32>, vector<16x128xf32> -> vector<16x128xf32>
    %c0_6 = arith.constant 0 : index
    %c0_7 = arith.constant 0 : index
    %c0_8 = arith.constant 0 : index
    %8 = vector.load %arg5[%c0_6, %c0_7, %c0_8] : memref<1x16x1xf32, #tpu.memory_space<vmem>>, vector<1x16x1xf32>
    %9 = vector.shape_cast %8 : vector<1x16x1xf32> to vector<16x1xf32>
    %c0_9 = arith.constant 0 : index
    %c0_10 = arith.constant 0 : index
    %c0_11 = arith.constant 0 : index
    %10 = vector.load %arg6[%c0_9, %c0_10, %c0_11] : memref<1x1x128xf32, #tpu.memory_space<vmem>>, vector<1x1x128xf32>
    %11 = vector.shape_cast %10 : vector<1x1x128xf32> to vector<1x128xf32>
    %12 = vector.broadcast %9 : vector<16x1xf32> to vector<16x128xf32>
    %13 = vector.broadcast %11 : vector<1x128xf32> to vector<16x128xf32>
    %14 = arith.addf %12, %13 : vector<16x128xf32>
    %cst_12 = arith.constant 2.000000e+00 : f32
    %15 = vector.broadcast %cst_12 : f32 to vector<16x128xf32>
    %16 = arith.mulf %15, %7 : vector<16x128xf32>
    %17 = arith.subf %14, %16 : vector<16x128xf32>
    %cst_13 = arith.constant 0.000000e+00 : f32
    %18 = vector.broadcast %cst_13 : f32 to vector<16x128xf32>
    %19 = arith.maximumf %17, %18 : vector<16x128xf32>
    %20 = math.sqrt %19 : vector<16x128xf32>
    %c128_i32 = arith.constant 128 : i32
    %21 = arith.muli %arg2, %c128_i32 : i32
    %c16_i32 = arith.constant 16 : i32
    %22 = arith.subi %c16_i32, %21 : i32
    %23 = tpu.iota {dimensions = array<i32: 1>} : vector<16x128xi32>
    %24 = vector.broadcast %22 : i32 to vector<16x128xi32>
    %25 = arith.cmpi slt, %23, %24 : vector<16x128xi32>
    %cst_14 = arith.constant 0.000000e+00 : f32
    %26 = vector.broadcast %cst_14 : f32 to vector<16x128xf32>
    %27 = arith.select %25, %20, %26 : vector<16x128xi1>, vector<16x128xf32>
    %c0_15 = arith.constant 0 : index
    %c0_16 = arith.constant 0 : index
    %28 = vector.load %arg8[%c0_15, %c0_16] : memref<1x128xf32, #tpu.memory_space<vmem>>, vector<1x128xf32>
    %cst_17 = arith.constant dense<0.000000e+00> : vector<128xf32>
    %29 = vector.multi_reduction <add>, %27, %cst_17 [0] : vector<16x128xf32> to vector<128xf32>
    %30 = vector.shape_cast %29 : vector<128xf32> to vector<1x128xf32>
    %31 = arith.addf %28, %30 : vector<1x128xf32>
    %c0_18 = arith.constant 0 : index
    %c0_19 = arith.constant 0 : index
    %32 = vector.load %arg8[%c0_18, %c0_19] : memref<1x128xf32, #tpu.memory_space<vmem>>, vector<1x128xf32>
    tpu.vector_store %arg8[%c0_18, %c0_19], %31 {strides = array<i32>} : memref<1x128xf32, #tpu.memory_space<vmem>>, vector<1x128xf32>,
    %c0_i32_20 = arith.constant 0 : i32
    %33 = arith.cmpi eq, %arg2, %c0_i32_20 : i32
    %34 = arith.extui %33 : i1 to i32
    %c0_i32_21 = arith.constant 0 : i32
    %35 = arith.cmpi ne, %34, %c0_i32_21 : i32
    scf.if %35 {
      %c0_22 = arith.constant 0 : index
      %c0_23 = arith.constant 0 : index
      %36 = vector.load %arg8[%c0_22, %c0_23] : memref<1x128xf32, #tpu.memory_space<vmem>>, vector<1x128xf32>
      %cst_24 = arith.constant dense<0.000000e+00> : vector<1xf32>
      %37 = vector.multi_reduction <add>, %36, %cst_24 [1] : vector<1x128xf32> to vector<1xf32>
      %38 = vector.shape_cast %37 : vector<1xf32> to vector<1x1xf32>
      %39 = vector.shape_cast %38 : vector<1x1xf32> to vector<1x1x1xf32>
      %c0_25 = arith.constant 0 : index
      %c0_26 = arith.constant 0 : index
      %c0_27 = arith.constant 0 : index
      %40 = vector.load %arg7[%c0_25, %c0_26, %c0_27] : memref<1x1x1xf32, #tpu.memory_space<vmem>>, vector<1x1x1xf32>
      tpu.vector_store %arg7[%c0_25, %c0_26, %c0_27], %39 {strides = array<i32>} : memref<1x1x1xf32, #tpu.memory_space<vmem>>, vector<1x1x1xf32>,
    } else {
    }
    return
  }
  func.func @transform_0(%arg0: i32, %arg1: i32, %arg2: i32) -> (i32, i32, i32) {
    %c0_i32 = arith.constant 0 : i32
    %c0_i32_0 = arith.constant 0 : i32
    return %arg0, %arg1, %c0_i32 : i32, i32, i32
  }
  func.func @transform_1(%arg0: i32, %arg1: i32, %arg2: i32) -> (i32, i32, i32) {
    %c0_i32 = arith.constant 0 : i32
    %c0_i32_0 = arith.constant 0 : i32
    return %arg0, %arg2, %c0_i32 : i32, i32, i32
  }
  func.func @transform_2(%arg0: i32, %arg1: i32, %arg2: i32) -> (i32, i32, i32) {
    %c0_i32 = arith.constant 0 : i32
    %c0_i32_0 = arith.constant 0 : i32
    return %arg0, %arg1, %c0_i32 : i32, i32, i32
  }
  func.func @transform_3(%arg0: i32, %arg1: i32, %arg2: i32) -> (i32, i32, i32) {
    %c0_i32 = arith.constant 0 : i32
    %c0_i32_0 = arith.constant 0 : i32
    return %arg0, %c0_i32, %arg2 : i32, i32, i32
  }
  func.func @transform_4(%arg0: i32, %arg1: i32, %arg2: i32) -> (i32, i32, i32) {
    %c1_i32 = arith.constant 1 : i32
    %0 = arith.muli %arg0, %c1_i32 : i32
    %1 = arith.addi %0, %arg1 : i32
    %c0_i32 = arith.constant 0 : i32
    %c0_i32_0 = arith.constant 0 : i32
    %c0_i32_1 = arith.constant 0 : i32
    return %1, %c0_i32, %c0_i32_0 : i32, i32, i32
  }
}

</mosaic_0001>

<bundles_post_ra>
// kernel: tpu_custom_call.1
= control target key start
LH: loop header
LB: loop body
LE: loop exit
PB: predicated region body
PF: predicated region fallthrough
CT: control target
= control target key end

     0   :  { %s849_s15 = smov 0   ;;  %s851_s16 = smov 0   ;;  %s952_s0 = inlined_call_operand.vmem [shape: f32[2,16,8], index: 0, kind: input, shape index: {}]   ;;  %s953_s1 = inlined_call_operand.vmem [shape: f32[2,16,8], index: 1, kind: input, shape index: {}]   ;;  %s954_s2 = inlined_call_operand.vmem [shape: f32[2,16,1], index: 2, kind: input, shape index: {}]   ;;  %s955_s3 = inlined_call_operand.vmem [shape: f32[2,1,16], index: 3, kind: input, shape index: {}]   ;;  %s956_s4 = inlined_call_operand.vmem [shape: f32[2,1,1], index: 4, kind: output, shape index: {}]  }
   0x1   :  { %s853_s17 = smov 0  }
   0x2 LB: > { %s33_s18 = sadd.s32 1, %s816_s16  ;;  %p683_p0 = scmp.ge.s32.totalorder %s820_s17, 1  ;;  %s820_s17 = sphi %s853_s17, %s14_s17   ;;  %s816_s16 = sphi %s851_s16, %s958_s16   ;;  %s812_s15 = sphi %s849_s15, %s957_s15  }
   0x3   : > { %p35_p1 = scmp.ge.s32.totalorder %s33_s18, 2  ;;  %p241_p2 = scmp.lt.s32.totalorder %s820_s17, 3 }
   0x5   : > { %s960_s18 = smov (%p35_p1, %s33_s18), 0  ;;  %p242_p3 = pnand %p683_p0, %p241_p2 }
   0x6   : > { %p297_p4 = scmp.lt.s32.totalorder (!%p242_p3), %s812_s15, 1 }
   0x7   : > { %245 = sbr.rel (%p242_p3) target bundleno = 464 (0x1d0), region = 36 }
   0xc   : > { %v822_v0 = vmov 0   ;;  %s962_s15 = smov (!%p297_p4, %s812_s15), 1  ;;  %vm364_vm0 = vcmask 64512   ;;  %v823_v21 = vmov 0.0   ;;  %v537_v35 = vlaneseq }
   0xd   : > { %793 = vset.pattern.permute.xlu0 %v822_v0  ;;  %s711_s19 = sshll.u32 %s962_s15, 4  ;;  %345 = vst [vmem:[#allocation2] sm:$0x1] %v823_v21  ;;  %s335_s5 = scalar_lea.vmem %s955_s3, %s962_s15  ;;  %vm557_vm6 = vcmask 1040384   ;;  %vm561_vm7 = vcmask 0  }
   0xe   : > { %s873_s22 = scalar_lea.vmem %s953_s1, %s711_s19  ;;  %s882_s25 = scalar_lea.vmem %s952_s0, %s711_s19  ;;  %v708_v23 = vld [vmem:[%s335_s5] ss:$0 sm:$0xff]  ;;  %v538_v38 = vand.u32 127, %v537_v35 }
   0xf   : > { %v363_v1 = vld [vmem:[%s873_s22 + $0x78] sm:$0xff]  ;;  %v362_v2 = vld [vmem:[%s873_s22 + $0x70] sm:$0xff]  ;;  %s328_s28 = scalar_lea.vmem %s954_s2, %s711_s19  ;;  %v361_v3 = vld [vmem:[%s873_s22 + $0x68] sm:$0xff]  ;;  %s339_s8 = scalar_lea.vmem %s956_s4, %s962_s15 }
  0x10   : > { %732 = vmatprep.subr.msk.mxu0 %vm364_vm0, %v363_v1  ;;  %v346_v4 = vld [vmem:[%s882_s25] sm:$0xff]  ;;  %v495_v7 = vld [vmem:[%s328_s28 + $0x8] sm:$0xff]  ;;  %v359_v8 = vld [vmem:[%s873_s22 + $0x58] sm:$0xff]  ;;  %vm540_vm3 = vcmp.lt.s32.totalorder %v538_v38, 16 }
  0x11   : > { %733 = vmatpush3.xpose.msk.msra.mxu0 %vm364_vm0, %v363_v1  ;;  %764 = vmatprep.mubr.msk.f32.mxu0 %vm364_vm0, %v346_v4  ;;  %v494_v5 = vld [vmem:[%s328_s28] sm:$0xff]  ;;  %v358_v9 = vld [vmem:[%s873_s22 + $0x50] sm:$0xff]  ;;  %v357_v10 = vld [vmem:[%s873_s22 + $0x48] sm:$0xff] }
  0x12   : > { %734 = vmatprep.subr.msk.mxu0 %vm364_vm0, %v362_v2  ;;  %499 = vperm.xlu0 %793, %v494_v5   ;;  %v360_v6 = vld [vmem:[%s873_s22 + $0x60] sm:$0xff]  ;;  %v355_v12 = vld [vmem:[%s873_s22 + $0x38] sm:$0xff]  ;;  %v354_v13 = vld [vmem:[%s873_s22 + $0x30] sm:$0xff] }
  0x13   : > { %v356_v11 = vld [vmem:[%s873_s22 + $0x40] sm:$0xff]  ;;  %v353_v14 = vld [vmem:[%s873_s22 + $0x28] sm:$0xff]  ;;  %v351_v16 = vld [vmem:[%s873_s22 + $0x18] sm:$0xff] }
  0x14   : > { %v352_v15 = vld [vmem:[%s873_s22 + $0x20] sm:$0xff]  ;;  %v350_v17 = vld [vmem:[%s873_s22 + $0x10] sm:$0xff]  ;;  %v349_v18 = vld [vmem:[%s873_s22 + $0x8] sm:$0xff] }
  0x15   : > { %735 = vmatpush3.xpose.msk.msra.mxu0 %vm364_vm0, %v362_v2  ;;  %v348_v19 = vld [vmem:[%s873_s22] sm:$0xff]  ;;  %v347_v20 = vld [vmem:[%s882_s25 + $0x8] sm:$0xff] }
  0x16   : > { %736 = vmatprep.subr.msk.mxu0 %vm364_vm0, %v361_v3  ;;  %504 = vperm.xlu0 %793, %v495_v7   ;;  %v543_v55 = vld [vmem:[#allocation2] sm:$0x1] }
  0x19   : > { %737 = vmatpush3.xpose.msk.msra.mxu0 %vm364_vm0, %v361_v3 }
  0x1a   : > { %738 = vmatprep.subr.msk.mxu0 %vm364_vm0, %v360_v6 }
  0x1d   : > { %739 = vmatpush3.xpose.msk.msra.mxu0 %vm364_vm0, %v360_v6 }
  0x1e   : > { %740 = vmatprep.subr.msk.mxu0 %vm364_vm0, %v359_v8 }
  0x21   : > { %741 = vmatpush3.xpose.msk.msra.mxu0 %vm364_vm0, %v359_v8 }
  0x22   : > { %742 = vmatprep.subr.msk.mxu0 %vm364_vm0, %v358_v9 }
  0x25   : > { %743 = vmatpush3.xpose.msk.msra.mxu0 %vm364_vm0, %v358_v9 }
  0x26   : > { %744 = vmatprep.subr.msk.mxu0 %vm364_vm0, %v357_v10 }
  0x29   : > { %745 = vmatpush3.xpose.msk.msra.mxu0 %vm364_vm0, %v357_v10 }
  0x2a   : > { %746 = vmatprep.subr.msk.mxu0 %vm364_vm0, %v356_v11 }
  0x2d   : > { %747 = vmatpush3.xpose.msk.msra.mxu0 %vm364_vm0, %v356_v11 }
  0x2e   : > { %748 = vmatprep.subr.msk.mxu0 %vm364_vm0, %v355_v12 }
  0x31   : > { %749 = vmatpush3.xpose.msk.msra.mxu0 %vm364_vm0, %v355_v12 }
  0x32   : > { %750 = vmatprep.subr.msk.mxu0 %vm364_vm0, %v354_v13 }
  0x35   : > { %751 = vmatpush3.xpose.msk.msra.mxu0 %vm364_vm0, %v354_v13 }
  0x36   : > { %752 = vmatprep.subr.msk.mxu0 %vm364_vm0, %v353_v14 }
  0x39   : > { %753 = vmatpush3.xpose.msk.msra.mxu0 %vm364_vm0, %v353_v14 }
  0x3a   : > { %754 = vmatprep.subr.msk.mxu0 %vm364_vm0, %v352_v15 }
  0x3d   : > { %755 = vmatpush3.xpose.msk.msra.mxu0 %vm364_vm0, %v352_v15 }
  0x3e   : > { %756 = vmatprep.subr.msk.mxu0 %vm364_vm0, %v351_v16 }
  0x41   : > { %757 = vmatpush3.xpose.msk.msra.mxu0 %vm364_vm0, %v351_v16 }
  0x42   : > { %758 = vmatprep.subr.msk.mxu0 %vm364_vm0, %v350_v17 }
  0x45   : > { %759 = vmatpush3.xpose.msk.msra.mxu0 %vm364_vm0, %v350_v17 }
  0x46   : > { %760 = vmatprep.subr.msk.mxu0 %vm364_vm0, %v349_v18 }
  0x49   : > { %761 = vmatpush3.xpose.msk.msra.mxu0 %vm364_vm0, %v349_v18 }
  0x4a   : > { %762 = vmatprep.subr.msk.mxu0 %vm364_vm0, %v348_v19 }
  0x4d   : > { %763 = vmatpush3.xpose.msk.msra.mxu0 %vm364_vm0, %v348_v19 }
  0x50   : > { %765 = vmatmul.mubr.msk.f32.vlgmr.msra.gmra.mxu0 %vm364_vm0, %v347_v20 }
  0x8d   : > { %v500_v22 = vpop.permute.xlu0 %499 }
  0x8e   : > { %v513_v29 = vadd.f32 %v708_v23, %v500_v22 }
  0x91   : > { %v505_v24 = vpop.permute.xlu0 %504 }
  0x92   : > { %v514_v26 = vadd.f32 %v708_v23, %v505_v24 }
 0x110   : > { %v766_v25 = vpop.f32.mrf.mxu0 }
 0x111   : > { %v516_v27 = vmul.f32 2.0, %v766_v25 }
 0x112   : > { %v485_v28 = vpop.f32.mrf.mxu0 }
 0x113   : > { %v518_v30 = vsub.f32 %v514_v26, %v516_v27  ;;  %v515_v31 = vmul.f32 2.0, %v485_v28 }
 0x115   : > { %v520_v32 = vmax.f32 %v518_v30, 0.0  ;;  %v517_v33 = vsub.f32 %v513_v29, %v515_v31 }
 0x117   : > { %794 = vrsqrt.f32 %v520_v32  ;;  %v519_v34 = vmax.f32 %v517_v33, 0.0  ;;  %vm530_vm1 = vcmp.eq.f32.partialorder %v520_v32, inf  ;;  %v533_v41 = vand.u32 2147483648, %v520_v32 }
 0x118   : > { %vm532_vm2 = vcmp.eq.f32.partialorder %v520_v32, 0.0 }
 0x119   : > { %796 = vrsqrt.f32 %v519_v34  ;;  %vm523_vm4 = vcmp.eq.f32.partialorder %v519_v34, inf  ;;  %v526_v44 = vand.u32 2147483648, %v519_v34  ;;  %vm525_vm5 = vcmp.eq.f32.partialorder %v519_v34, 0.0 }
 0x124   : > { %v795_v36 = vpop.eup %794 }
 0x125   : > { %v529_v37 = vmul.f32 %v795_v36, %v520_v32 }
 0x126   : > { %v797_v39 = vpop.eup %796 }
 0x127   : > { %v531_v40 = vsel %vm530_vm1, %v520_v32, %v529_v37  ;;  %v522_v42 = vmul.f32 %v797_v39, %v519_v34 }
 0x128   : > { %v534_v43 = vsel %vm532_vm2, %v533_v41, %v531_v40 }
 0x129   : > { %v524_v45 = vsel %vm523_vm4, %v519_v34, %v522_v42  ;;  %v542_v47 = vsel %vm540_vm3, %v534_v43, 0.0 }
 0x12a   : > { %v527_v46 = vsel %vm525_vm5, %v526_v44, %v524_v45 }
 0x12b   : > { %v541_v48 = vsel %vm540_vm3, %v527_v46, 0.0 }
 0x12c   : > { %v544_v49 = vadd.f32 %v542_v47, %v541_v48 }
 0x12e   : > { %v545_v50 = vrot.slane %v544_v49, 4 }
 0x130   : > { %v546_v51 = vadd.f32 %v545_v50, %v544_v49 }
 0x132   : > { %v547_v52 = vrot.slane %v546_v51, 2 }
 0x134   : > { %v548_v53 = vadd.f32 %v547_v52, %v546_v51 }
 0x136   : > { %v549_v54 = vrot.slane %v548_v53, 1 }
 0x138   : > { %v550_v56 = vadd.f32 %v549_v54, %v548_v53 }
 0x13a   : > { %v551_v57 = vadd.f32 %v550_v56, %v543_v55 }
 0x13c   : > { %552 = vst [vmem:[#allocation2] sm:$0x1] %v551_v57 }
 0x143   : > { %v556_v58 = vld [vmem:[#allocation2] sm:$0x1] }
 0x144   : > { %v558_v59 = vsel %vm557_vm6, %v556_v58, 0.0 }
 0x145   : > { %559 = vadd.xlane.f32.xlu1 %v558_v59 }
 0x1ce   : > { %v560_v60 = vpop.xlane.xlu1 %559 }
 0x1cf   : > { %562 = vst.msk [vmem:[%s339_s8] sm:$0x1] %vm561_vm7, %v560_v60 }
 0x1d0 PF: > { %s14_s17 = sadd.s32 1, %s820_s17   ;;  %s957_s15 = smov %s816_s16 }
 0x1d1   : > { %p11_p5 = scmp.ge.s32.totalorder %s14_s17, 4   ;;  %s958_s16 = smov %s960_s18 }
 0x1d3   :  { %13 = sbr.rel (!%p11_p5) target bundleno = 2 (0x2), region = 83 }

</bundles_post_ra>
